<compile_context>
chip_gen: v5e
topology: v5e:2x2
jax: 0.10.0
libtpu: 0.0.40
codegen_flags: <defaults>
</compile_context>

<pallas_src>
import jax
import jax.numpy as jnp
from jax.experimental import pallas as pl
from jax.experimental.pallas import tpu as pltpu


# ----------------------------------------------------------------------------
# Kernel: fused 3-layer MLP on one (tb, D) batch tile
# ----------------------------------------------------------------------------
def _mlp_kernel(x_ref, w1_ref, b1_ref, w2_ref, b2_ref, w3_ref, b3_ref, o_ref):
    cdt = w1_ref.dtype  # MXU operand dtype (bf16 by default, f32 optional)

    # fc1 + ReLU  (cast state to the compute dtype in vregs; f32 accumulate)
    x = x_ref[...].astype(cdt)
    h1 = jnp.dot(x, w1_ref[...], preferred_element_type=jnp.float32)
    h1 = jnp.maximum(h1 + b1_ref[...], 0.0)

    # fc2 + ReLU
    h2 = jnp.dot(h1.astype(cdt), w2_ref[...], preferred_element_type=jnp.float32)
    h2 = jnp.maximum(h2 + b2_ref[...], 0.0)

    # fc3 (no activation)
    out = jnp.dot(h2.astype(cdt), w3_ref[...], preferred_element_type=jnp.float32)
    o_ref[...] = (out + b3_ref[...]).astype(o_ref.dtype)


# ----------------------------------------------------------------------------
# Parameter preparation (done ONCE, outside the per-call path)
# ----------------------------------------------------------------------------
def prepare_params(params, compute_dtype=jnp.bfloat16):
    """Cast weights to the MXU compute dtype and biases to f32 (1, out).

    Call this once (e.g. at init or after each optimizer step) and reuse the
    returned pytree for every forward call, so no per-call cast/pad XLA
    kernels run before the Pallas kernel.
    """
    def w(name):
        return params[name].astype(compute_dtype)

    def b(name):
        v = params[name].astype(jnp.float32)
        return v.reshape(1, -1) if v.ndim == 1 else v

    return {"w1": w("w1"), "b1": b("b1"),
            "w2": w("w2"), "b2": b("b2"),
            "w3": w("w3"), "b3": b("b3")}


# ----------------------------------------------------------------------------
# Wrapper
# ----------------------------------------------------------------------------
def _round_up(x, m):
    return ((x + m - 1) // m) * m


def _choose_batch_tile(B):
    """Generation-aware batch tile.

    * B <= 512: one tile (grid=(1,)). On single-TC v5e/v6e the grid is a
      serial loop, so extra steps are pure overhead; on v7x small batches
      don't amortize duplicating the resident weights into each TC's VMEM.
    * Larger B: 512-row tiles (1024 for very large batches) — multiples of
      256 for MXU/bf16 packing; the 'parallel' grid axis then shards across
      the two TensorCores on v7x and software-pipelines the batch DMA.
      Per-tile working set (~3 MB at tb=1024) is far below every chip's VMEM.
    """
    if B <= 512:
        return _round_up(max(B, 1), 16)
    if B <= 4096:
        return 512
    return 1024


def policy_network_forward(state, prepared, *, batch_tile=None):
    """3-layer MLP forward as a single fused Pallas kernel.

    state    : (B, input_dims) float32
    prepared : pytree from `prepare_params` (weights in compute dtype,
               biases f32 with shape (1, out)).
    """
    w1, b1 = prepared["w1"], prepared["b1"]
    w2, b2 = prepared["w2"], prepared["b2"]
    w3, b3 = prepared["w3"], prepared["b3"]

    B, D = state.shape
    A = w3.shape[1]
    out_dtype = state.dtype

    # ---- batch tiling (rounded to 16 for bf16 sublane packing) ----
    tb = batch_tile if batch_tile is not None else _choose_batch_tile(B)
    tb = _round_up(tb, 16)
    Bp = _round_up(B, tb)
    if Bp != B:
        state = jnp.pad(state, ((0, Bp - B), (0, 0)))
    grid = (Bp // tb,)

    # Weights/biases: full-array blocks, constant index_map -> resident in VMEM.
    full = lambda a: pl.BlockSpec(a.shape, lambda i: (0, 0))

    out = pl.pallas_call(
        _mlp_kernel,
        out_shape=jax.ShapeDtypeStruct((Bp, A), out_dtype),
        grid_spec=pltpu.PrefetchScalarGridSpec(
            num_scalar_prefetch=0,
            grid=grid,
            in_specs=[
                # Last block dim == full array dim (D, A small) is legal; no
                # wrapper-side 128-lane padding of K or the output.
                pl.BlockSpec((tb, D), lambda i: (i, 0)),   # state tile
                full(w1), full(b1),
                full(w2), full(b2),
                full(w3), full(b3),
            ],
            out_specs=pl.BlockSpec((tb, A), lambda i: (i, 0)),
        ),
        compiler_params=pltpu.CompilerParams(
            dimension_semantics=("parallel",),
        ),
    )(state, w1, b1, w2, b2, w3, b3)

    # Strip batch-row padding only if any was added (A is already exact).
    return out if Bp == B else out[:B]


# ----------------------------------------------------------------------------
# Params & reference
# ----------------------------------------------------------------------------
def init_params(key, input_dims, n_actions, hidden=256):
    """Mimics PyTorch nn.Linear default init:
    U(-1/sqrt(fan_in), 1/sqrt(fan_in)) for weight and bias."""
    def linear(k, fan_in, fan_out):
        kw, kb = jax.random.split(k)
        bound = 1.0 / jnp.sqrt(fan_in)
        w = jax.random.uniform(kw, (fan_in, fan_out), jnp.float32, -bound, bound)
        b = jax.random.uniform(kb, (1, fan_out), jnp.float32, -bound, bound)
        return w, b

    k1, k2, k3 = jax.random.split(key, 3)
    w1, b1 = linear(k1, input_dims, hidden)
    w2, b2 = linear(k2, hidden, hidden)
    w3, b3 = linear(k3, hidden, n_actions)
    return {"w1": w1, "b1": b1, "w2": w2, "b2": b2, "w3": w3, "b3": b3}


def _reference_forward(state, p):
    h1 = jnp.maximum(state @ p["w1"] + p["b1"], 0.0)
    h2 = jnp.maximum(h1 @ p["w2"] + p["b2"], 0.0)
    return h2 @ p["w3"] + p["b3"]


# TODO(synk): the PyTorch module also owns an Adam optimizer / device move;
# those are training-side bookkeeping, not part of forward, and are omitted.

if __name__ == "__main__":
    key = jax.random.PRNGKey(0)
    k_params, k_state = jax.random.split(key)

    batch = 8
    input_dims = 8      # *input_dims in the PyTorch module
    n_actions = 4

    params = init_params(k_params, input_dims, n_actions)
    state = jax.random.normal(k_state, (batch, input_dims), jnp.float32)
    ref = _reference_forward(state, params)

    # One-time parameter preparation (hoisted out of the per-call path).
    params_f32 = prepare_params(params, compute_dtype=jnp.float32)
    params_bf16 = prepare_params(params, compute_dtype=jnp.bfloat16)

    # Exact-f32 path (tight tolerance vs f32 reference).
    out_f32 = jax.block_until_ready(policy_network_forward(state, params_f32))
    assert out_f32.shape == (batch, n_actions)
    assert jnp.allclose(out_f32, ref, atol=1e-4, rtol=1e-4), "f32 mismatch"

    # Default bf16-MXU path (f32 accumulation) — looser tolerance.
    out_bf16 = jax.block_until_ready(policy_network_forward(state, params_bf16))
    assert out_bf16.shape == (batch, n_actions)
    assert jnp.allclose(out_bf16, ref, atol=5e-2, rtol=5e-2), "bf16 mismatch"

    # Remainder-batch path (B not a multiple of the tile) exercises padding.
    state_odd = jax.random.normal(k_state, (6, input_dims), jnp.float32)
    out_odd = jax.block_until_ready(
        policy_network_forward(state_odd, params_bf16))
    assert out_odd.shape == (6, n_actions)
    assert jnp.allclose(out_odd, _reference_forward(state_odd, params),
                        atol=5e-2, rtol=5e-2), "padded-batch mismatch"

    # Larger batch exercises the multi-tile 'parallel' grid (tb=512, 2 steps).
    state_big = jax.random.normal(k_state, (600, input_dims), jnp.float32)
    out_big = jax.block_until_ready(
        policy_network_forward(state_big, params_bf16))
    assert out_big.shape == (600, n_actions)
    assert jnp.allclose(out_big, _reference_forward(state_big, params),
                        atol=5e-2, rtol=5e-2), "multi-tile mismatch"

    print("KERNEL_OK")
</pallas_src>

<mosaic_0001>
module attributes {stable_mosaic.version = 11 : i64} {
  func.func @_mlp_kernel(%arg0: i32, %arg1: memref<16x8xf32, #tpu.memory_space<vmem>>, %arg2: memref<8x256xf32, #tpu.memory_space<vmem>>, %arg3: memref<1x256xf32, #tpu.memory_space<vmem>>, %arg4: memref<256x256xf32, #tpu.memory_space<vmem>>, %arg5: memref<1x256xf32, #tpu.memory_space<vmem>>, %arg6: memref<256x4xf32, #tpu.memory_space<vmem>>, %arg7: memref<1x4xf32, #tpu.memory_space<vmem>>, %arg8: memref<16x4xf32, #tpu.memory_space<vmem>>) attributes {dimension_semantics = [#tpu.dimension_semantics<parallel>], iteration_bounds = array<i64: 1>, scalar_prefetch = 0 : i64, scratch_operands = 0 : i64, tpu.core_type = #tpu.core_type<tc>, window_params = [{transform_indices = @transform_0, window_bounds = array<i64: 16, 8>}, {pipeline_mode = #tpu.pipeline_mode<synchronous>, transform_indices = @transform_1, window_bounds = array<i64: 8, 256>}, {pipeline_mode = #tpu.pipeline_mode<synchronous>, transform_indices = @transform_2, window_bounds = array<i64: 1, 256>}, {pipeline_mode = #tpu.pipeline_mode<synchronous>, transform_indices = @transform_3, window_bounds = array<i64: 256, 256>}, {pipeline_mode = #tpu.pipeline_mode<synchronous>, transform_indices = @transform_4, window_bounds = array<i64: 1, 256>}, {pipeline_mode = #tpu.pipeline_mode<synchronous>, transform_indices = @transform_5, window_bounds = array<i64: 256, 4>}, {pipeline_mode = #tpu.pipeline_mode<synchronous>, transform_indices = @transform_6, window_bounds = array<i64: 1, 4>}, {transform_indices = @transform_7, window_bounds = array<i64: 16, 4>}]} {
    %c0 = arith.constant 0 : index
    %c0_0 = arith.constant 0 : index
    %0 = vector.load %arg1[%c0, %c0_0] : memref<16x8xf32, #tpu.memory_space<vmem>>, vector<16x8xf32>
    %c0_1 = arith.constant 0 : index
    %c0_2 = arith.constant 0 : index
    %1 = vector.load %arg2[%c0_1, %c0_2] : memref<8x256xf32, #tpu.memory_space<vmem>>, vector<8x256xf32>
    %cst = arith.constant dense<0.000000e+00> : vector<16x256xf32>
    %2 = tpu.matmul %0, %1, %cst {dimension_numbers = #tpu.dot_dimension_numbers<[1], [0], [0], [1], [0, 0, 1, 1], [], []>} : vector<16x8xf32>, vector<8x256xf32>, vector<16x256xf32> -> vector<16x256xf32>
    %c0_3 = arith.constant 0 : index
    %c0_4 = arith.constant 0 : index
    %3 = vector.load %arg3[%c0_3, %c0_4] : memref<1x256xf32, #tpu.memory_space<vmem>>, vector<1x256xf32>
    %4 = vector.broadcast %3 : vector<1x256xf32> to vector<16x256xf32>
    %5 = arith.addf %2, %4 : vector<16x256xf32>
    %cst_5 = arith.constant 0.000000e+00 : f32
    %6 = vector.broadcast %cst_5 : f32 to vector<16x256xf32>
    %7 = arith.maximumf %5, %6 : vector<16x256xf32>
    %c0_6 = arith.constant 0 : index
    %c0_7 = arith.constant 0 : index
    %8 = vector.load %arg4[%c0_6, %c0_7] : memref<256x256xf32, #tpu.memory_space<vmem>>, vector<256x256xf32>
    %cst_8 = arith.constant dense<0.000000e+00> : vector<16x256xf32>
    %9 = tpu.matmul %7, %8, %cst_8 {dimension_numbers = #tpu.dot_dimension_numbers<[1], [0], [0], [1], [0, 0, 1, 1], [], []>} : vector<16x256xf32>, vector<256x256xf32>, vector<16x256xf32> -> vector<16x256xf32>
    %c0_9 = arith.constant 0 : index
    %c0_10 = arith.constant 0 : index
    %10 = vector.load %arg5[%c0_9, %c0_10] : memref<1x256xf32, #tpu.memory_space<vmem>>, vector<1x256xf32>
    %11 = vector.broadcast %10 : vector<1x256xf32> to vector<16x256xf32>
    %12 = arith.addf %9, %11 : vector<16x256xf32>
    %cst_11 = arith.constant 0.000000e+00 : f32
    %13 = vector.broadcast %cst_11 : f32 to vector<16x256xf32>
    %14 = arith.maximumf %12, %13 : vector<16x256xf32>
    %c0_12 = arith.constant 0 : index
    %c0_13 = arith.constant 0 : index
    %15 = vector.load %arg6[%c0_12, %c0_13] : memref<256x4xf32, #tpu.memory_space<vmem>>, vector<256x4xf32>
    %cst_14 = arith.constant dense<0.000000e+00> : vector<16x4xf32>
    %16 = tpu.matmul %14, %15, %cst_14 {dimension_numbers = #tpu.dot_dimension_numbers<[1], [0], [0], [1], [0, 0, 1, 1], [], []>} : vector<16x256xf32>, vector<256x4xf32>, vector<16x4xf32> -> vector<16x4xf32>
    %c0_15 = arith.constant 0 : index
    %c0_16 = arith.constant 0 : index
    %17 = vector.load %arg7[%c0_15, %c0_16] : memref<1x4xf32, #tpu.memory_space<vmem>>, vector<1x4xf32>
    %18 = vector.broadcast %17 : vector<1x4xf32> to vector<16x4xf32>
    %19 = arith.addf %16, %18 : vector<16x4xf32>
    %c0_17 = arith.constant 0 : index
    %c0_18 = arith.constant 0 : index
    %20 = vector.load %arg8[%c0_17, %c0_18] : memref<16x4xf32, #tpu.memory_space<vmem>>, vector<16x4xf32>
    tpu.vector_store %arg8[%c0_17, %c0_18], %19 {strides = array<i32>} : memref<16x4xf32, #tpu.memory_space<vmem>>, vector<16x4xf32>,
    return
  }
  func.func @transform_0(%arg0: i32) -> (i32, i32) {
    %c0_i32 = arith.constant 0 : i32
    %c0_i32_0 = arith.constant 0 : i32
    return %arg0, %c0_i32 : i32, i32
  }
  func.func @transform_1(%arg0: i32) -> (i32, i32) {
    %c0_i32 = arith.constant 0 : i32
    %c0_i32_0 = arith.constant 0 : i32
    %c0_i32_1 = arith.constant 0 : i32
    return %c0_i32, %c0_i32_0 : i32, i32
  }
  func.func @transform_2(%arg0: i32) -> (i32, i32) {
    %c0_i32 = arith.constant 0 : i32
    %c0_i32_0 = arith.constant 0 : i32
    %c0_i32_1 = arith.constant 0 : i32
    return %c0_i32, %c0_i32_0 : i32, i32
  }
  func.func @transform_3(%arg0: i32) -> (i32, i32) {
    %c0_i32 = arith.constant 0 : i32
    %c0_i32_0 = arith.constant 0 : i32
    %c0_i32_1 = arith.constant 0 : i32
    return %c0_i32, %c0_i32_0 : i32, i32
  }
  func.func @transform_4(%arg0: i32) -> (i32, i32) {
    %c0_i32 = arith.constant 0 : i32
    %c0_i32_0 = arith.constant 0 : i32
    %c0_i32_1 = arith.constant 0 : i32
    return %c0_i32, %c0_i32_0 : i32, i32
  }
  func.func @transform_5(%arg0: i32) -> (i32, i32) {
    %c0_i32 = arith.constant 0 : i32
    %c0_i32_0 = arith.constant 0 : i32
    %c0_i32_1 = arith.constant 0 : i32
    return %c0_i32, %c0_i32_0 : i32, i32
  }
  func.func @transform_6(%arg0: i32) -> (i32, i32) {
    %c0_i32 = arith.constant 0 : i32
    %c0_i32_0 = arith.constant 0 : i32
    %c0_i32_1 = arith.constant 0 : i32
    return %c0_i32, %c0_i32_0 : i32, i32
  }
  func.func @transform_7(%arg0: i32) -> (i32, i32) {
    %c0_i32 = arith.constant 0 : i32
    %c0_i32_0 = arith.constant 0 : i32
    return %arg0, %c0_i32 : i32, i32
  }
}

</mosaic_0001>

<bundles_post_ra>
// kernel: tpu_custom_call.1
= control target key start
LH: loop header
LB: loop body
LE: loop exit
PB: predicated region body
PF: predicated region fallthrough
CT: control target
= control target key end

     0   :  { %12 = vsyncpa [#allocation3], 0  ;;  %s431_s27 = smov [#allocation2]   ;;  %s432_s29 = smov 256   ;;  %s604_s0 = inlined_call_operand.vmem [shape: f32[16,8], index: 0, kind: input, shape index: {}]   ;;  %s605_s1 = inlined_call_operand.vmem [shape: f32[8,256], index: 1, kind: input, shape index: {}]   ;;  %s606_s2 = inlined_call_operand.vmem [shape: f32[1,256], index: 2, kind: input, shape index: {}]   ;;  %s607_s3 = inlined_call_operand.hbm [shape: f32[256,256], index: 3, kind: input, shape index: {}]   ;;  %s608_s4 = inlined_call_operand.vmem [shape: f32[1,256], index: 4, kind: input, shape index: {}]   ;;  %s609_s5 = inlined_call_operand.vmem [shape: f32[256,4], index: 5, kind: input, shape index: {}]   ;;  %s610_s6 = inlined_call_operand.vmem [shape: f32[1,4], index: 6, kind: input, shape index: {}]   ;;  %s611_s7 = inlined_call_operand.vmem [shape: f32[16,4], index: 7, kind: output, shape index: {}]  }
   0x1   :  { %s23_s26 = sshll.u32 %s607_s3, 4  ;;  %s25_s28 = sshll.u32 %s431_s27, 4  ;;  %s24_s26 = int_to_ptr.hbm [resolvable:$true] %s23_s26  ;;  %s26_s28 = int_to_ptr.vmem [resolvable:$true] %s25_s28 }
   0x2   :  { %s433_s30 = smov 16  }
   0x3   :  { %31 = dma.hbm_to_vmem [thread:$0]  %s24_s26, 8192, %s26_s28, [#allocation3], %s432_s29, %s432_s29, %s433_s30  }
   0x4   :  { %429 = dma.done.wait [#allocation3], 8192  }
   0x5   :  { %430 = vsyncadd [#allocation3], 4294959104  ;;  %vm52_vm0 = vcmask 64512   ;;  %v44_v0 = vld [vmem:[%s605_s1] sm:$0xff]  ;;  %v45_v2 = vld [vmem:[%s605_s1 + $0x8] sm:$0xff]  ;;  %vm357_vm1 = vcmask 31744  }
   0x6   :  { %v42_v1 = vld [vmem:[%s604_s0] sm:$0xff]  ;;  %74 = vmatpush.msra.mxu0 %v44_v0  ;;  %97 = vmatpush.msra.mxu1 %v45_v2  ;;  %v139_v3 = vld [vmem:[#allocation2 + $0xf0] sm:$0xff]  ;;  %v140_v4 = vld [vmem:[#allocation2 + $0xf8] sm:$0xff] }
   0x7   :  { %365 = vmatmul.msk.f32.vlgmr.msra.gmra.mxu0 %vm52_vm0, %v42_v1  ;;  %367 = vmatmul.msk.f32.vlgmr.msra.gmra.mxu1 %vm52_vm0, %v42_v1  ;;  %v137_v5 = vld [vmem:[#allocation2 + $0xe0] sm:$0xff]  ;;  %v171_v6 = vld [vmem:[#allocation2 + $0x1f0] sm:$0xff]  ;;  %v138_v7 = vld [vmem:[#allocation2 + $0xe8] sm:$0xff] }
   0x8   :  { %179 = vmatpush.msra.mxu2 %v139_v3  ;;  %225 = vmatpush.msrb.mxu0 %v140_v4  ;;  %v172_v8 = vld [vmem:[#allocation2 + $0x1f8] sm:$0xff]  ;;  %v169_v9 = vld [vmem:[#allocation2 + $0x1e0] sm:$0xff]  ;;  %v135_v10 = vld [vmem:[#allocation2 + $0xd0] sm:$0xff] }
   0x9   :  { %202 = vmatpush.msra.mxu3 %v171_v6  ;;  %248 = vmatpush.msrb.mxu1 %v172_v8  ;;  %v136_v11 = vld [vmem:[#allocation2 + $0xd8] sm:$0xff]  ;;  %v170_v12 = vld [vmem:[#allocation2 + $0x1e8] sm:$0xff]  ;;  %v167_v13 = vld [vmem:[#allocation2 + $0x1d0] sm:$0xff] }
   0xa   :  { %180 = vmatpush.msra.mxu2 %v137_v5  ;;  %226 = vmatpush.msrb.mxu0 %v138_v7  ;;  %v168_v14 = vld [vmem:[#allocation2 + $0x1d8] sm:$0xff]  ;;  %v133_v15 = vld [vmem:[#allocation2 + $0xc0] sm:$0xff]  ;;  %v134_v16 = vld [vmem:[#allocation2 + $0xc8] sm:$0xff] }
   0xb   :  { %203 = vmatpush.msra.mxu3 %v169_v9  ;;  %249 = vmatpush.msrb.mxu1 %v170_v12  ;;  %v43_v17 = vld [vmem:[%s604_s0 + $0x8] sm:$0xff]  ;;  %v131_v18 = vld [vmem:[#allocation2 + $0xb0] sm:$0xff]  ;;  %v165_v19 = vld [vmem:[#allocation2 + $0x1c0] sm:$0xff] }
   0xc   :  { %181 = vmatpush.msra.mxu2 %v135_v10  ;;  %227 = vmatpush.msrb.mxu0 %v136_v11  ;;  %v132_v20 = vld [vmem:[#allocation2 + $0xb8] sm:$0xff]  ;;  %v166_v21 = vld [vmem:[#allocation2 + $0x1c8] sm:$0xff]  ;;  %v129_v22 = vld [vmem:[#allocation2 + $0xa0] sm:$0xff] }
   0xd   :  { %204 = vmatpush.msra.mxu3 %v167_v13  ;;  %250 = vmatpush.msrb.mxu1 %v168_v14  ;;  %v163_v23 = vld [vmem:[#allocation2 + $0x1b0] sm:$0xff]  ;;  %v130_v24 = vld [vmem:[#allocation2 + $0xa8] sm:$0xff]  ;;  %v164_v25 = vld [vmem:[#allocation2 + $0x1b8] sm:$0xff] }
   0xe   :  { %182 = vmatpush.msra.mxu2 %v133_v15  ;;  %228 = vmatpush.msrb.mxu0 %v134_v16  ;;  %v127_v26 = vld [vmem:[#allocation2 + $0x90] sm:$0xff]  ;;  %v161_v27 = vld [vmem:[#allocation2 + $0x1a0] sm:$0xff]  ;;  %v128_v28 = vld [vmem:[#allocation2 + $0x98] sm:$0xff] }
   0xf   :  { %366 = vmatmul.msk.f32.gmra.mxu0 %vm52_vm0, %v43_v17  ;;  %368 = vmatmul.msk.f32.gmra.mxu1 %vm52_vm0, %v43_v17  ;;  %v162_v29 = vld [vmem:[#allocation2 + $0x1a8] sm:$0xff]  ;;  %v125_v30 = vld [vmem:[#allocation2 + $0x80] sm:$0xff]  ;;  %v159_v31 = vld [vmem:[#allocation2 + $0x190] sm:$0xff] }
  0x10   :  { %183 = vmatpush.msra.mxu2 %v131_v18  ;;  %205 = vmatpush.msra.mxu3 %v165_v19  ;;  %v126_v32 = vld [vmem:[#allocation2 + $0x88] sm:$0xff]  ;;  %v160_v33 = vld [vmem:[#allocation2 + $0x198] sm:$0xff]  ;;  %v123_v34 = vld [vmem:[#allocation2 + $0x70] sm:$0xff] }
  0x11   :  { %229 = vmatpush.msrb.mxu0 %v132_v20  ;;  %251 = vmatpush.msrb.mxu1 %v166_v21  ;;  %v157_v35 = vld [vmem:[#allocation2 + $0x180] sm:$0xff]  ;;  %v124_v36 = vld [vmem:[#allocation2 + $0x78] sm:$0xff]  ;;  %v158_v37 = vld [vmem:[#allocation2 + $0x188] sm:$0xff] }
  0x12   :  { %184 = vmatpush.msra.mxu2 %v129_v22  ;;  %206 = vmatpush.msra.mxu3 %v163_v23  ;;  %v121_v38 = vld [vmem:[#allocation2 + $0x60] sm:$0xff]  ;;  %v155_v39 = vld [vmem:[#allocation2 + $0x170] sm:$0xff]  ;;  %v122_v40 = vld [vmem:[#allocation2 + $0x68] sm:$0xff] }
  0x13   :  { %230 = vmatpush.msrb.mxu0 %v130_v24  ;;  %252 = vmatpush.msrb.mxu1 %v164_v25  ;;  %v156_v41 = vld [vmem:[#allocation2 + $0x178] sm:$0xff]  ;;  %v119_v42 = vld [vmem:[#allocation2 + $0x50] sm:$0xff]  ;;  %v153_v43 = vld [vmem:[#allocation2 + $0x160] sm:$0xff] }
  0x14   :  { %185 = vmatpush.msra.mxu2 %v127_v26  ;;  %207 = vmatpush.msra.mxu3 %v161_v27  ;;  %v120_v44 = vld [vmem:[#allocation2 + $0x58] sm:$0xff]  ;;  %v154_v45 = vld [vmem:[#allocation2 + $0x168] sm:$0xff]  ;;  %v117_v46 = vld [vmem:[#allocation2 + $0x40] sm:$0xff] }
  0x15   :  { %231 = vmatpush.msrb.mxu0 %v128_v28  ;;  %253 = vmatpush.msrb.mxu1 %v162_v29  ;;  %v151_v47 = vld [vmem:[#allocation2 + $0x150] sm:$0xff]  ;;  %v118_v48 = vld [vmem:[#allocation2 + $0x48] sm:$0xff]  ;;  %v152_v49 = vld [vmem:[#allocation2 + $0x158] sm:$0xff] }
  0x16   :  { %186 = vmatpush.msra.mxu2 %v125_v30  ;;  %208 = vmatpush.msra.mxu3 %v159_v31  ;;  %v115_v50 = vld [vmem:[#allocation2 + $0x30] sm:$0xff]  ;;  %v149_v51 = vld [vmem:[#allocation2 + $0x140] sm:$0xff]  ;;  %v116_v52 = vld [vmem:[#allocation2 + $0x38] sm:$0xff] }
  0x17   :  { %232 = vmatpush.msrb.mxu0 %v126_v32  ;;  %254 = vmatpush.msrb.mxu1 %v160_v33  ;;  %v150_v53 = vld [vmem:[#allocation2 + $0x148] sm:$0xff]  ;;  %v113_v54 = vld [vmem:[#allocation2 + $0x20] sm:$0xff]  ;;  %v147_v55 = vld [vmem:[#allocation2 + $0x130] sm:$0xff] }
  0x18   :  { %187 = vmatpush.msra.mxu2 %v123_v34  ;;  %209 = vmatpush.msra.mxu3 %v157_v35  ;;  %v114_v56 = vld [vmem:[#allocation2 + $0x28] sm:$0xff]  ;;  %v148_v57 = vld [vmem:[#allocation2 + $0x138] sm:$0xff]  ;;  %v111_v58 = vld [vmem:[#allocation2 + $0x10] sm:$0xff] }
  0x19   :  { %233 = vmatpush.msrb.mxu0 %v124_v36  ;;  %255 = vmatpush.msrb.mxu1 %v158_v37  ;;  %v145_v59 = vld [vmem:[#allocation2 + $0x120] sm:$0xff]  ;;  %v112_v60 = vld [vmem:[#allocation2 + $0x18] sm:$0xff]  ;;  %v146_v61 = vld [vmem:[#allocation2 + $0x128] sm:$0xff] }
  0x1a   :  { %188 = vmatpush.msra.mxu2 %v121_v38  ;;  %210 = vmatpush.msra.mxu3 %v155_v39  ;;  %v109_v62 = vld [vmem:[#allocation2] sm:$0xff]  ;;  %v143_v63 = vld [vmem:[#allocation2 + $0x110] sm:$0xff]  ;;  %v110_v0 = vld [vmem:[#allocation2 + $0x8] sm:$0xff] }
  0x1b   :  { %234 = vmatpush.msrb.mxu0 %v122_v40  ;;  %256 = vmatpush.msrb.mxu1 %v156_v41  ;;  %v144_v1 = vld [vmem:[#allocation2 + $0x118] sm:$0xff]  ;;  %v141_v2 = vld [vmem:[#allocation2 + $0x100] sm:$0xff]  ;;  %v142_v3 = vld [vmem:[#allocation2 + $0x108] sm:$0xff] }
  0x1c   :  { %189 = vmatpush.msra.mxu2 %v119_v42  ;;  %211 = vmatpush.msra.mxu3 %v153_v43  ;;  %v306_v4 = vld [vmem:[%s609_s5 + $0xf8] sm:$0xff]  ;;  %v305_v5 = vld [vmem:[%s609_s5 + $0xf0] sm:$0xff]  ;;  %v304_v8 = vld [vmem:[%s609_s5 + $0xe8] sm:$0xff] }
  0x1d   :  { %235 = vmatpush.msrb.mxu0 %v120_v44  ;;  %257 = vmatpush.msrb.mxu1 %v154_v45  ;;  %v290_v6 = vld [vmem:[%s609_s5 + $0x78] sm:$0xff]  ;;  %v289_v7 = vld [vmem:[%s609_s5 + $0x70] sm:$0xff]  ;;  %v288_v9 = vld [vmem:[%s609_s5 + $0x68] sm:$0xff] }
  0x1e   :  { %190 = vmatpush.msra.mxu2 %v117_v46  ;;  %212 = vmatpush.msra.mxu3 %v151_v47  ;;  %v303_v10 = vld [vmem:[%s609_s5 + $0xe0] sm:$0xff]  ;;  %v302_v12 = vld [vmem:[%s609_s5 + $0xd8] sm:$0xff]  ;;  %v301_v14 = vld [vmem:[%s609_s5 + $0xd0] sm:$0xff] }
  0x1f   :  { %236 = vmatpush.msrb.mxu0 %v118_v48  ;;  %258 = vmatpush.msrb.mxu1 %v152_v49  ;;  %v287_v11 = vld [vmem:[%s609_s5 + $0x60] sm:$0xff]  ;;  %v286_v13 = vld [vmem:[%s609_s5 + $0x58] sm:$0xff]  ;;  %v285_v15 = vld [vmem:[%s609_s5 + $0x50] sm:$0xff] }
  0x20   :  { %191 = vmatpush.msra.mxu2 %v115_v50  ;;  %213 = vmatpush.msra.mxu3 %v149_v51  ;;  %v300_v16 = vld [vmem:[%s609_s5 + $0xc8] sm:$0xff]  ;;  %v46_v18 = vld [vmem:[%s606_s2] sm:$0x3]  ;;  %v298_v21 = vld [vmem:[%s609_s5 + $0xb8] sm:$0xff] }
  0x21   :  { %237 = vmatpush.msrb.mxu0 %v116_v52  ;;  %259 = vmatpush.msrb.mxu1 %v150_v53  ;;  %v284_v17 = vld [vmem:[%s609_s5 + $0x48] sm:$0xff]  ;;  %v299_v19 = vld [vmem:[%s609_s5 + $0xc0] sm:$0xff]  ;;  %v48_v22 = vperm.slane %v46_v18, 0  ;;  %v49_v23 = vperm.slane %v46_v18, 1  ;;  %v282_v24 = vld [vmem:[%s609_s5 + $0x38] sm:$0xff] }
  0x22   :  { %192 = vmatpush.msra.mxu2 %v113_v54  ;;  %214 = vmatpush.msra.mxu3 %v147_v55  ;;  %v283_v20 = vld [vmem:[%s609_s5 + $0x40] sm:$0xff]  ;;  %v297_v25 = vld [vmem:[%s609_s5 + $0xb0] sm:$0xff]  ;;  %v296_v28 = vld [vmem:[%s609_s5 + $0xa8] sm:$0xff] }
  0x23   :  { %238 = vmatpush.msrb.mxu0 %v114_v56  ;;  %260 = vmatpush.msrb.mxu1 %v148_v57  ;;  %v295_v33 = vld [vmem:[%s609_s5 + $0xa0] sm:$0xff]  ;;  %v281_v40 = vld [vmem:[%s609_s5 + $0x30] sm:$0xff]  ;;  %v294_v41 = vld [vmem:[%s609_s5 + $0x98] sm:$0xff] }
  0x24   :  { %193 = vmatpush.msra.mxu2 %v111_v58  ;;  %215 = vmatpush.msra.mxu3 %v145_v59  ;;  %v280_v42 = vld [vmem:[%s609_s5 + $0x28] sm:$0xff]  ;;  %v293_v43 = vld [vmem:[%s609_s5 + $0x90] sm:$0xff]  ;;  %v279_v44 = vld [vmem:[%s609_s5 + $0x20] sm:$0xff] }
  0x25   :  { %239 = vmatpush.msrb.mxu0 %v112_v60  ;;  %261 = vmatpush.msrb.mxu1 %v146_v61  ;;  %v292_v45 = vld [vmem:[%s609_s5 + $0x88] sm:$0xff]  ;;  %v278_v46 = vld [vmem:[%s609_s5 + $0x18] sm:$0xff]  ;;  %v291_v47 = vld [vmem:[%s609_s5 + $0x80] sm:$0xff] }
  0x26   :  { %194 = vmatpush.msra.mxu2 %v109_v62  ;;  %216 = vmatpush.msra.mxu3 %v143_v63  ;;  %v277_v48 = vld [vmem:[%s609_s5 + $0x10] sm:$0xff]  ;;  %v276_v49 = vld [vmem:[%s609_s5 + $0x8] sm:$0xff]  ;;  %v275_v50 = vld [vmem:[%s609_s5] sm:$0xff] }
  0x27   :  { %240 = vmatpush.msrb.mxu0 %v110_v0  ;;  %262 = vmatpush.msrb.mxu1 %v144_v1  ;;  %v173_v51 = vld [vmem:[%s608_s4] sm:$0x3] }
  0x28   :  { %217 = vmatpush.msra.mxu3 %v141_v2  ;;  %369 = vmatpush.msrb.mxu2 %v290_v6  ;;  %v176_v52 = vperm.slane %v173_v51, 1  ;;  %v175_v57 = vperm.slane %v173_v51, 0 }
  0x29   :  { %263 = vmatpush.msrb.mxu1 %v142_v3  ;;  %311 = vmatpush.msra.mxu0 %v290_v6 }
  0x2a   :  { %385 = vmatpush.msrb.mxu3 %v306_v4  ;;  %370 = vmatpush.msrb.mxu2 %v289_v7 }
  0x2b   :  { %334 = vmatpush.msra.mxu1 %v306_v4  ;;  %312 = vmatpush.msra.mxu0 %v289_v7 }
  0x2c   :  { %386 = vmatpush.msrb.mxu3 %v305_v5  ;;  %371 = vmatpush.msrb.mxu2 %v288_v9 }
  0x2d   :  { %335 = vmatpush.msra.mxu1 %v305_v5  ;;  %313 = vmatpush.msra.mxu0 %v288_v9 }
  0x2e   :  { %387 = vmatpush.msrb.mxu3 %v304_v8  ;;  %372 = vmatpush.msrb.mxu2 %v287_v11 }
  0x2f   :  { %336 = vmatpush.msra.mxu1 %v304_v8  ;;  %314 = vmatpush.msra.mxu0 %v287_v11 }
  0x30   :  { %388 = vmatpush.msrb.mxu3 %v303_v10  ;;  %373 = vmatpush.msrb.mxu2 %v286_v13 }
  0x31   :  { %337 = vmatpush.msra.mxu1 %v303_v10  ;;  %315 = vmatpush.msra.mxu0 %v286_v13  ;;  %v404_v10 = vld [vmem:[%s610_s6] ss:$0 sm:$0xff] }
  0x32   :  { %389 = vmatpush.msrb.mxu3 %v302_v12  ;;  %374 = vmatpush.msrb.mxu2 %v285_v15 }
  0x33   :  { %338 = vmatpush.msra.mxu1 %v302_v12  ;;  %316 = vmatpush.msra.mxu0 %v285_v15 }
  0x34   :  { %390 = vmatpush.msrb.mxu3 %v301_v14  ;;  %375 = vmatpush.msrb.mxu2 %v284_v17 }
  0x35   :  { %339 = vmatpush.msra.mxu1 %v301_v14  ;;  %317 = vmatpush.msra.mxu0 %v284_v17 }
  0x36   :  { %391 = vmatpush.msrb.mxu3 %v300_v16  ;;  %376 = vmatpush.msrb.mxu2 %v283_v20 }
  0x37   :  { %340 = vmatpush.msra.mxu1 %v300_v16  ;;  %318 = vmatpush.msra.mxu0 %v283_v20 }
  0x38   :  { %392 = vmatpush.msrb.mxu3 %v299_v19  ;;  %377 = vmatpush.msrb.mxu2 %v282_v24 }
  0x39   :  { %341 = vmatpush.msra.mxu1 %v299_v19  ;;  %319 = vmatpush.msra.mxu0 %v282_v24 }
  0x3a   :  { %393 = vmatpush.msrb.mxu3 %v298_v21  ;;  %378 = vmatpush.msrb.mxu2 %v281_v40 }
  0x3b   :  { %342 = vmatpush.msra.mxu1 %v298_v21  ;;  %320 = vmatpush.msra.mxu0 %v281_v40 }
  0x3c   :  { %394 = vmatpush.msrb.mxu3 %v297_v25  ;;  %379 = vmatpush.msrb.mxu2 %v280_v42 }
  0x3d   :  { %343 = vmatpush.msra.mxu1 %v297_v25  ;;  %321 = vmatpush.msra.mxu0 %v280_v42 }
  0x3e   :  { %395 = vmatpush.msrb.mxu3 %v296_v28  ;;  %380 = vmatpush.msrb.mxu2 %v279_v44 }
  0x3f   :  { %344 = vmatpush.msra.mxu1 %v296_v28  ;;  %322 = vmatpush.msra.mxu0 %v279_v44 }
  0x40   :  { %396 = vmatpush.msrb.mxu3 %v295_v33  ;;  %381 = vmatpush.msrb.mxu2 %v278_v46 }
  0x41   :  { %345 = vmatpush.msra.mxu1 %v295_v33  ;;  %323 = vmatpush.msra.mxu0 %v278_v46 }
  0x42   :  { %397 = vmatpush.msrb.mxu3 %v294_v41  ;;  %382 = vmatpush.msrb.mxu2 %v277_v48 }
  0x43   :  { %346 = vmatpush.msra.mxu1 %v294_v41  ;;  %324 = vmatpush.msra.mxu0 %v277_v48 }
  0x44   :  { %398 = vmatpush.msrb.mxu3 %v293_v43  ;;  %383 = vmatpush.msrb.mxu2 %v276_v49 }
  0x45   :  { %347 = vmatpush.msra.mxu1 %v293_v43  ;;  %325 = vmatpush.msra.mxu0 %v276_v49 }
  0x46   :  { %399 = vmatpush.msrb.mxu3 %v292_v45  ;;  %384 = vmatpush.msrb.mxu2 %v275_v50 }
  0x47   :  { %348 = vmatpush.msra.mxu1 %v292_v45  ;;  %326 = vmatpush.msra.mxu0 %v275_v50 }
  0x48   :  { %400 = vmatpush.msrb.mxu3 %v291_v47 }
  0x49   :  { %349 = vmatpush.msra.mxu1 %v291_v47 }
  0x84   :  { %v76_v26 = vpop.f32.mrf.mxu0  ;;  %v99_v27 = vpop.f32.mrf.mxu1 }
  0x85   :  { %v77_v29 = vadd.f32 %v76_v26, %v48_v22  ;;  %v100_v30 = vadd.f32 %v99_v27, %v49_v23 }
  0x87   :  { %v105_v31 = vmax.f32 %v77_v29, 0.0  ;;  %v106_v32 = vmax.f32 %v100_v30, 0.0 }
  0x89   :  { %195 = vmatmul.f32.vlgmr.msra.gmra.mxu2 %v105_v31  ;;  %241 = vmatmul.f32.vlgmr.msrb.gmra.mxu0 %v105_v31 }
  0x8a   :  { %218 = vmatmul.f32.vlgmr.msra.gmra.mxu3 %v106_v32  ;;  %264 = vmatmul.f32.vlgmr.msrb.gmra.mxu1 %v106_v32 }
  0x8c   :  { %v79_v34 = vpop.f32.mrf.mxu0  ;;  %v102_v35 = vpop.f32.mrf.mxu1 }
  0x8d   :  { %v80_v36 = vadd.f32 %v79_v34, %v48_v22  ;;  %v103_v37 = vadd.f32 %v102_v35, %v49_v23 }
  0x8f   :  { %v107_v38 = vmax.f32 %v80_v36, 0.0  ;;  %v108_v39 = vmax.f32 %v103_v37, 0.0 }
  0x91   :  { %198 = vmatmul.f32.gmra.mxu2 %v107_v38  ;;  %244 = vmatmul.f32.gmra.mxu0 %v107_v38 }
  0x92   :  { %221 = vmatmul.f32.gmra.mxu3 %v108_v39  ;;  %267 = vmatmul.f32.gmra.mxu1 %v108_v39 }
 0x106   :  { %v242_v53 = vpop.f32.mrf.mxu0 }
 0x107   :  { %v243_v54 = vadd.f32 %v242_v53, %v176_v52  ;;  %v265_v55 = vpop.f32.mrf.mxu1 }
 0x109   :  { %v266_v56 = vadd.f32 %v265_v55, %v243_v54 }
 0x10b   :  { %v272_v58 = vmax.f32 %v266_v56, 0.0 }
 0x10c   :  { %v196_v59 = vpop.f32.mrf.mxu2 }
 0x10d   :  { %v197_v60 = vadd.f32 %v196_v59, %v175_v57  ;;  %350 = vmatmul.f32.vlgmr.msra.gmra.mxu1 %v272_v58  ;;  %v219_v61 = vpop.f32.mrf.mxu3 }
 0x10e   :  { %v245_v62 = vpop.f32.mrf.mxu0 }
 0x10f   :  { %v220_v63 = vadd.f32 %v219_v61, %v197_v60  ;;  %v246_v0 = vadd.f32 %v245_v62, %v176_v52  ;;  %v268_v1 = vpop.f32.mrf.mxu1 }
 0x111   :  { %v271_v2 = vmax.f32 %v220_v63, 0.0  ;;  %v269_v3 = vadd.f32 %v268_v1, %v246_v0 }
 0x113   :  { %v274_v4 = vmax.f32 %v269_v3, 0.0  ;;  %327 = vmatmul.f32.vlgmr.msra.gmra.mxu0 %v271_v2 }
 0x114   :  { %v199_v5 = vpop.f32.mrf.mxu2 }
 0x115   :  { %v200_v6 = vadd.f32 %v199_v5, %v175_v57  ;;  %353 = vmatmul.f32.vlgmr.msrb.gmra.mxu3 %v274_v4  ;;  %v222_v7 = vpop.f32.mrf.mxu3 }
 0x117   :  { %v223_v8 = vadd.f32 %v222_v7, %v200_v6 }
 0x119   :  { %v273_v9 = vmax.f32 %v223_v8, 0.0 }
 0x11b   :  { %330 = vmatmul.f32.vlgmr.msrb.gmra.mxu2 %v273_v9 }
 0x18a   :  { %v351_v13 = vpop.f32.mrf.mxu1 }
 0x190   :  { %v328_v11 = vpop.f32.mrf.mxu0 }
 0x191   :  { %v329_v12 = vadd.f32 %v404_v10, %v328_v11 }
 0x193   :  { %v352_v14 = vadd.f32 %v351_v13, %v329_v12 }
 0x195   :  { %358 = vst.msk [vmem:[%s611_s7] sm:$0xff] %vm357_vm1, %v352_v14 }
 0x198   :  { %v354_v17 = vpop.f32.mrf.mxu3 }
 0x19e   :  { %v331_v15 = vpop.f32.mrf.mxu2 }
 0x19f   :  { %v332_v16 = vadd.f32 %v404_v10, %v331_v15 }
 0x1a1   :  { %v355_v18 = vadd.f32 %v354_v17, %v332_v16 }
 0x1a3   :  { %359 = vst.msk [vmem:[%s611_s7 + $0x8] sm:$0xff] %vm357_vm1, %v355_v18 }
 0x1a4   :  { %364 = vsyncpa [#allocation3], 1 }

</bundles_post_ra>
